<compile_context>
chip_gen: v5e
topology: v5e:2x2
jax: 0.10.0
libtpu: 0.0.40
codegen_flags: <defaults>
</compile_context>

<pallas_src>
import functools

import numpy as np
import jax
import jax.numpy as jnp
from jax import lax
from jax.experimental import pallas as pl
from jax.experimental.pallas import tpu as pltpu

EPS = 1e-8
_LANE = 128


def _round_up(x, m):
    return ((x + m - 1) // m) * m


def _sum_all(a):
    """(R, C) -> (1, 1) f32 sum: cheap sublane (VPU) reduce first, then one
    cross-lane (XLU) reduce of a single row."""
    return jnp.sum(jnp.sum(a, axis=0, keepdims=True), axis=1, keepdims=True)


def _make_wem_kernel(strip, n_strips):
    """Kernel for one (batch, row-tile) grid step.

    Streams the (1, Ht, W) block strip-by-strip so the f32 temporaries stay
    O(strip * W) regardless of the DMA block size, and writes three partial
    sums into a lane-dense (8, 128) output tile:
      sublane 0: sum(x^2)   sublane 1: sum(x)   sublane 2: sum(block_sum^2)
    where block_sum is the sum over each non-overlapping 2x2 block
    (LL = 0.5 * block_sum, so sum(LL^2) = 0.25 * sum(block_sum^2)).
    """

    def kernel(x_ref, out_ref):
        w = x_ref.shape[2]

        # --- One-off (outside the hot loop) probe of pltpu.roll's rotate
        # direction.  After c = v + roll(v, 1, axis), position j holds the
        # within-2-block pair sum at odd j if the roll brought element j-1,
        # and at even j otherwise.  This keeps the kernel sign-agnostic for
        # the cost of one 8x128 vreg of work per grid step.
        lane = lax.broadcasted_iota(jnp.int32, (8, _LANE), 1)
        partner = pltpu.roll(lane, shift=1, axis=1)
        brings_prev = _sum_all(jnp.where(partner == lane - 1, 1.0, 0.0))
        valid_parity = jnp.where(brings_prev > 0.0, 1, 0)        # (1,1) int32

        # Static parity mask, hoisted out of the strip loop.  Wrap-around
        # partners only ever land on the invalid parity, so no special case.
        ci = lax.broadcasted_iota(jnp.int32, (strip, w), 1)
        ri = lax.broadcasted_iota(jnp.int32, (strip, w), 0)
        ll_mask = jnp.logical_and((ci & 1) == valid_parity,
                                  (ri & 1) == valid_parity)

        def body(s, carry):
            tot, sm, bsq = carry
            off = pl.multiple_of(s * strip, 8)
            x = x_ref[0, pl.ds(off, strip), :].astype(jnp.float32)
            tot = tot + _sum_all(x * x)
            sm = sm + _sum_all(x)
            c = x + pltpu.roll(x, shift=1, axis=1)   # column-pair sums (XLU)
            r = c + pltpu.roll(c, shift=1, axis=0)   # + row pair -> 2x2 block sums
            bsq = bsq + _sum_all(jnp.where(ll_mask, r * r, 0.0))
            return tot, sm, bsq

        zero = jnp.zeros((1, 1), jnp.float32)
        tot, sm, bsq = lax.fori_loop(0, n_strips, body, (zero, zero, zero),
                                     unroll=(n_strips <= 4))

        # Lane-dense, unmasked (8, 128) store of the three partial sums.
        row = lax.broadcasted_iota(jnp.int32, (8, _LANE), 0)
        out_ref[0, 0, :, :] = jnp.where(row == 0, tot,
                                        jnp.where(row == 1, sm,
                                                  jnp.where(row == 2, bsq, 0.0)))

    return kernel


def _plan_tiling(H, w_pad, itemsize, block_bytes, strip_bytes):
    """Choose (rows per DMA block, padded H, rows per compute strip).

    Block rows: largest multiple-of-8 row count whose (Ht, W) block of the
    *input dtype* fits `block_bytes` (big blocks amortize the ~0.35us/step
    overhead and keep the HBM DMA near roofline).  Prefer a divisor of H (no
    padding copy); otherwise pad H with zero rows (exact for this loss).
    Strip rows: multiple-of-8 divisor of the block rows whose f32 temporaries
    fit `strip_bytes`, decoupling VMEM temporary footprint from block size.
    """
    row_bytes = max(1, w_pad * itemsize)
    budget_rows = max(8, (block_bytes // row_bytes) // 8 * 8)
    h8 = _round_up(H, 8)
    if h8 <= budget_rows:
        ht, padded_h = h8, h8
    else:
        ht, padded_h = 0, 0
        if H % 8 == 0:
            # Prefer a divisor of H within 2x of the budget -> no padding copy.
            for cand in range(budget_rows, max(budget_rows // 2, 7), -8):
                if H % cand == 0:
                    ht, padded_h = cand, H
                    break
        if ht == 0:
            ht = budget_rows
            padded_h = _round_up(H, ht)

    strip_budget = max(8, (strip_bytes // max(1, w_pad * 4)) // 8 * 8)
    strip = 8
    for cand in range(min(strip_budget, ht), 7, -8):
        if ht % cand == 0:
            strip = cand
            break
    return ht, padded_h, strip


def wem_loss(pred_mask, *, block_bytes=4 << 20, strip_bytes=1 << 20):
    """JAX/Pallas equivalent of WEMLoss.forward.  pred_mask: (B, 1, H, W)."""
    B, C, H, W = pred_mask.shape
    assert C == 1, "WEMLoss expects a single-channel mask"
    assert H % 2 == 0 and W % 2 == 0, \
        "even H, W required (level-1 haar DWT; pywt 'symmetric' == 2x2 blocks)"

    # Channel squeeze is a free reshape; keep the native dtype and upcast to
    # f32 inside the kernel once the block is already in VMEM.
    x = pred_mask.reshape(B, H, W)
    itemsize = jnp.dtype(pred_mask.dtype).itemsize

    # Zero padding is exact for this loss (zero 2x2 blocks add nothing to any
    # partial sum; the epilogue uses the true H*W): pad W to a lane-dense
    # multiple of 128 and H to a multiple of the row tile.
    w_pad = _round_up(W, _LANE)
    block_bytes = min(int(block_bytes), 16 << 20)   # keep v7x (64 MiB VMEM) safe
    ht, padded_h, strip = _plan_tiling(H, w_pad, itemsize, block_bytes,
                                       int(strip_bytes))
    if padded_h != H or w_pad != W:
        # TODO(synk): this costs one extra HBM copy for awkward shapes; a
        # masked ragged last tile would avoid it but is not worth it here.
        x = jnp.pad(x, ((0, 0), (0, padded_h - H), (0, w_pad - W)))
    nr = padded_h // ht
    n_strips = ht // strip

    in_block_bytes = ht * w_pad * itemsize
    strip_f32_bytes = strip * w_pad * 4
    vmem_limit = int(2 * in_block_bytes        # double-buffered input block
                     + 8 * strip_f32_bytes     # live f32/i32 strip temporaries
                     + (2 << 20))              # output buffers + slack

    partial = pl.pallas_call(
        _make_wem_kernel(strip, n_strips),
        out_shape=jax.ShapeDtypeStruct((B, nr, 8, _LANE), jnp.float32),
        grid_spec=pltpu.PrefetchScalarGridSpec(
            num_scalar_prefetch=0,
            grid=(B, nr),
            in_specs=[pl.BlockSpec((1, ht, w_pad), lambda b, r: (b, r, 0))],
            out_specs=pl.BlockSpec((1, 1, 8, _LANE), lambda b, r: (b, r, 0, 0)),
        ),
        compiler_params=pltpu.CompilerParams(
            dimension_semantics=("parallel", "parallel"),
            vmem_limit_bytes=vmem_limit),
        cost_estimate=pl.CostEstimate(
            flops=int(12 * B * padded_h * w_pad),
            transcendentals=0,
            bytes_accessed=int(B * padded_h * w_pad * itemsize
                               + B * nr * 8 * _LANE * 4)),
    )(x)

    # Tiny O(B * nr) epilogue in plain JAX (exact PyTorch math).
    tot = jnp.sum(partial[:, :, 0, 0], axis=1)            # sum(x^2)
    sm = jnp.sum(partial[:, :, 1, 0], axis=1)             # sum(x)
    ll = 0.25 * jnp.sum(partial[:, :, 2, 0], axis=1)      # sum(LL^2)

    hf = jnp.maximum(tot - ll, 0.0)                       # Parseval: LH^2+HL^2+HH^2
    E = hf / (tot + EPS)
    gamma = sm / float(C * H * W)                         # true (unpadded) size
    E_c = jnp.clip(E, EPS, 1.0 - EPS)
    term1 = gamma * (1.0 - gamma) * jnp.log(E_c)
    term2 = jnp.abs(1.0 - 2.0 * gamma) * jnp.log(1.0 - E_c)
    return jnp.mean(term1 - term2)


def _wem_loss_ref(pred_mask):
    """Pure-JAX reference (explicit 2x2-block haar subbands, no Parseval)."""
    x = pred_mask[:, 0].astype(jnp.float32)
    a = x[:, 0::2, 0::2]
    b = x[:, 0::2, 1::2]
    c = x[:, 1::2, 0::2]
    d = x[:, 1::2, 1::2]
    p_lh = 0.5 * ((a + b) - (c + d))
    p_hl = 0.5 * ((a - b) + (c - d))
    p_hh = 0.5 * ((a - b) - (c - d))
    hf = jnp.sum(p_lh ** 2 + p_hl ** 2 + p_hh ** 2, axis=(1, 2))
    tot = jnp.sum(x * x, axis=(1, 2))
    gamma = jnp.mean(x, axis=(1, 2))
    E = hf / (tot + EPS)
    E_c = jnp.clip(E, EPS, 1.0 - EPS)
    t1 = gamma * (1.0 - gamma) * jnp.log(E_c)
    t2 = jnp.abs(1.0 - 2.0 * gamma) * jnp.log(1.0 - E_c)
    return jnp.mean(t1 - t2)


if __name__ == "__main__":
    key = jax.random.PRNGKey(0)
    k1, k2, k3 = jax.random.split(key, 3)

    # Case 1: module-like small shape, f32 probability mask in [0, 1].
    pred = jax.random.uniform(k1, (2, 1, 16, 16), dtype=jnp.float32)
    loss = jax.jit(wem_loss)(pred)
    jax.block_until_ready(loss)
    np.testing.assert_allclose(np.asarray(loss), np.asarray(_wem_loss_ref(pred)),
                               rtol=1e-4, atol=1e-6)

    # Case 2: bf16 input with forced small block / strip budgets (exercises the
    # multi-row-tile grid, the in-kernel strip loop, and the in-kernel upcast).
    pred2 = jax.random.uniform(k2, (2, 1, 32, 128),
                               dtype=jnp.float32).astype(jnp.bfloat16)
    loss2 = jax.jit(functools.partial(wem_loss,
                                      block_bytes=16 * 128 * 2,
                                      strip_bytes=8 * 128 * 4))(pred2)
    jax.block_until_ready(loss2)
    np.testing.assert_allclose(np.asarray(loss2), np.asarray(_wem_loss_ref(pred2)),
                               rtol=1e-4, atol=1e-6)

    # Case 3: even-but-awkward H, W (exercises the exact zero-padding path).
    pred3 = jax.random.uniform(k3, (2, 1, 20, 24), dtype=jnp.float32)
    loss3 = jax.jit(wem_loss)(pred3)
    jax.block_until_ready(loss3)
    np.testing.assert_allclose(np.asarray(loss3), np.asarray(_wem_loss_ref(pred3)),
                               rtol=1e-4, atol=1e-6)

    print("KERNEL_OK")
</pallas_src>

<mosaic_0001>
module attributes {stable_mosaic.version = 11 : i64} {
  func.func @kernel(%arg0: i32, %arg1: i32, %arg2: memref<1x16x128xf32, #tpu.memory_space<vmem>>, %arg3: memref<1x1x8x128xf32, #tpu.memory_space<vmem>>) attributes {dimension_semantics = [#tpu.dimension_semantics<parallel>, #tpu.dimension_semantics<parallel>], iteration_bounds = array<i64: 2, 1>, scalar_prefetch = 0 : i64, scratch_operands = 0 : i64, tpu.core_type = #tpu.core_type<tc>, window_params = [{transform_indices = @transform_0, window_bounds = array<i64: 1, 16, 128>}, {transform_indices = @transform_1, window_bounds = array<i64: 1, 1, 8, 128>}]} {
    %0 = tpu.iota {dimensions = array<i32: 1>} : vector<8x128xi32>
    %c1_i32 = arith.constant 1 : i32
    %1 = tpu.dynamic_rotate %0 by %c1_i32 dim 1 : vector<8x128xi32>, i32 -> vector<8x128xi32>
    %c1_i32_0 = arith.constant 1 : i32
    %2 = vector.broadcast %c1_i32_0 : i32 to vector<8x128xi32>
    %3 = arith.subi %0, %2 : vector<8x128xi32>
    %4 = arith.cmpi eq, %1, %3 : vector<8x128xi32>
    %cst = arith.constant 1.000000e+00 : f32
    %cst_1 = arith.constant 0.000000e+00 : f32
    %5 = vector.broadcast %cst : f32 to vector<8x128xf32>
    %6 = vector.broadcast %cst_1 : f32 to vector<8x128xf32>
    %7 = arith.select %4, %5, %6 : vector<8x128xi1>, vector<8x128xf32>
    %cst_2 = arith.constant dense<0.000000e+00> : vector<128xf32>
    %8 = vector.multi_reduction <add>, %7, %cst_2 [0] : vector<8x128xf32> to vector<128xf32>
    %9 = vector.shape_cast %8 : vector<128xf32> to vector<1x128xf32>
    %cst_3 = arith.constant dense<0.000000e+00> : vector<1xf32>
    %10 = vector.multi_reduction <add>, %9, %cst_3 [1] : vector<1x128xf32> to vector<1xf32>
    %11 = vector.shape_cast %10 : vector<1xf32> to vector<1x1xf32>
    %cst_4 = arith.constant 0.000000e+00 : f32
    %12 = vector.broadcast %cst_4 : f32 to vector<1x1xf32>
    %13 = arith.cmpf ogt, %11, %12 : vector<1x1xf32>
    %c1_i32_5 = arith.constant 1 : i32
    %c0_i32 = arith.constant 0 : i32
    %14 = vector.broadcast %c1_i32_5 : i32 to vector<1x1xi32>
    %15 = vector.broadcast %c0_i32 : i32 to vector<1x1xi32>
    %16 = arith.select %13, %14, %15 : vector<1x1xi1>, vector<1x1xi32>
    %17 = tpu.iota {dimensions = array<i32: 1>} : vector<16x128xi32>
    %18 = tpu.iota {dimensions = array<i32: 0>} : vector<16x128xi32>
    %c1_i32_6 = arith.constant 1 : i32
    %19 = vector.broadcast %c1_i32_6 : i32 to vector<16x128xi32>
    %20 = arith.andi %17, %19 : vector<16x128xi32>
    %21 = vector.broadcast %16 : vector<1x1xi32> to vector<16x128xi32>
    %22 = arith.cmpi eq, %20, %21 : vector<16x128xi32>
    %c1_i32_7 = arith.constant 1 : i32
    %23 = vector.broadcast %c1_i32_7 : i32 to vector<16x128xi32>
    %24 = arith.andi %18, %23 : vector<16x128xi32>
    %25 = vector.broadcast %16 : vector<1x1xi32> to vector<16x128xi32>
    %26 = arith.cmpi eq, %24, %25 : vector<16x128xi32>
    %27 = arith.andi %22, %26 : vector<16x128xi1>
    %cst_8 = arith.constant 0.000000e+00 : f32
    %28 = vector.broadcast %cst_8 : f32 to vector<1x1xf32>
    %c0_i32_9 = arith.constant 0 : i32
    %c16_i32 = arith.constant 16 : i32
    %29 = arith.muli %c0_i32_9, %c16_i32 : i32
    %30 = tpu.assume_multiple %29, 8 : i32
    %c0 = arith.constant 0 : index
    %31 = arith.index_cast %30 : i32 to index
    %c0_10 = arith.constant 0 : index
    %32 = vector.load %arg2[%c0, %31, %c0_10] : memref<1x16x128xf32, #tpu.memory_space<vmem>>, vector<1x16x128xf32>
    %33 = vector.shape_cast %32 : vector<1x16x128xf32> to vector<16x128xf32>
    %34 = arith.mulf %33, %33 : vector<16x128xf32>
    %cst_11 = arith.constant dense<0.000000e+00> : vector<128xf32>
    %35 = vector.multi_reduction <add>, %34, %cst_11 [0] : vector<16x128xf32> to vector<128xf32>
    %36 = vector.shape_cast %35 : vector<128xf32> to vector<1x128xf32>
    %cst_12 = arith.constant dense<0.000000e+00> : vector<1xf32>
    %37 = vector.multi_reduction <add>, %36, %cst_12 [1] : vector<1x128xf32> to vector<1xf32>
    %38 = vector.shape_cast %37 : vector<1xf32> to vector<1x1xf32>
    %39 = arith.addf %28, %38 : vector<1x1xf32>
    %cst_13 = arith.constant dense<0.000000e+00> : vector<128xf32>
    %40 = vector.multi_reduction <add>, %33, %cst_13 [0] : vector<16x128xf32> to vector<128xf32>
    %41 = vector.shape_cast %40 : vector<128xf32> to vector<1x128xf32>
    %cst_14 = arith.constant dense<0.000000e+00> : vector<1xf32>
    %42 = vector.multi_reduction <add>, %41, %cst_14 [1] : vector<1x128xf32> to vector<1xf32>
    %43 = vector.shape_cast %42 : vector<1xf32> to vector<1x1xf32>
    %44 = arith.addf %28, %43 : vector<1x1xf32>
    %c1_i32_15 = arith.constant 1 : i32
    %45 = tpu.dynamic_rotate %33 by %c1_i32_15 dim 1 : vector<16x128xf32>, i32 -> vector<16x128xf32>
    %46 = arith.addf %33, %45 : vector<16x128xf32>
    %c1_i32_16 = arith.constant 1 : i32
    %47 = tpu.dynamic_rotate %46 by %c1_i32_16 dim 0 : vector<16x128xf32>, i32 -> vector<16x128xf32>
    %48 = arith.addf %46, %47 : vector<16x128xf32>
    %49 = arith.mulf %48, %48 : vector<16x128xf32>
    %cst_17 = arith.constant 0.000000e+00 : f32
    %50 = vector.broadcast %cst_17 : f32 to vector<16x128xf32>
    %51 = arith.select %27, %49, %50 : vector<16x128xi1>, vector<16x128xf32>
    %cst_18 = arith.constant dense<0.000000e+00> : vector<128xf32>
    %52 = vector.multi_reduction <add>, %51, %cst_18 [0] : vector<16x128xf32> to vector<128xf32>
    %53 = vector.shape_cast %52 : vector<128xf32> to vector<1x128xf32>
    %cst_19 = arith.constant dense<0.000000e+00> : vector<1xf32>
    %54 = vector.multi_reduction <add>, %53, %cst_19 [1] : vector<1x128xf32> to vector<1xf32>
    %55 = vector.shape_cast %54 : vector<1xf32> to vector<1x1xf32>
    %56 = arith.addf %28, %55 : vector<1x1xf32>
    %c1_i32_20 = arith.constant 1 : i32
    %57 = tpu.iota {dimensions = array<i32: 0>} : vector<8x128xi32>
    %c0_i32_21 = arith.constant 0 : i32
    %58 = vector.broadcast %c0_i32_21 : i32 to vector<8x128xi32>
    %59 = arith.cmpi eq, %57, %58 : vector<8x128xi32>
    %c1_i32_22 = arith.constant 1 : i32
    %60 = vector.broadcast %c1_i32_22 : i32 to vector<8x128xi32>
    %61 = arith.cmpi eq, %57, %60 : vector<8x128xi32>
    %c2_i32 = arith.constant 2 : i32
    %62 = vector.broadcast %c2_i32 : i32 to vector<8x128xi32>
    %63 = arith.cmpi eq, %57, %62 : vector<8x128xi32>
    %cst_23 = arith.constant 0.000000e+00 : f32
    %64 = vector.shape_cast %56 : vector<1x1xf32> to vector<1x1xf32>
    %65 = vector.broadcast %64 : vector<1x1xf32> to vector<8x128xf32>
    %66 = vector.broadcast %cst_23 : f32 to vector<8x128xf32>
    %67 = arith.select %63, %65, %66 : vector<8x128xi1>, vector<8x128xf32>
    %68 = vector.shape_cast %44 : vector<1x1xf32> to vector<1x1xf32>
    %69 = vector.broadcast %68 : vector<1x1xf32> to vector<8x128xf32>
    %70 = arith.select %61, %69, %67 : vector<8x128xi1>, vector<8x128xf32>
    %71 = vector.shape_cast %39 : vector<1x1xf32> to vector<1x1xf32>
    %72 = vector.broadcast %71 : vector<1x1xf32> to vector<8x128xf32>
    %73 = arith.select %59, %72, %70 : vector<8x128xi1>, vector<8x128xf32>
    %c0_24 = arith.constant 0 : index
    %c0_25 = arith.constant 0 : index
    %c0_26 = arith.constant 0 : index
    %c0_27 = arith.constant 0 : index
    %74 = vector.load %arg3[%c0_24, %c0_25, %c0_26, %c0_27] : memref<1x1x8x128xf32, #tpu.memory_space<vmem>>, vector<1x1x8x128xf32>
    %75 = vector.shape_cast %74 : vector<1x1x8x128xf32> to vector<8x128xf32>
    %76 = vector.shape_cast %73 : vector<8x128xf32> to vector<1x1x8x128xf32>
    tpu.vector_store %arg3[%c0_24, %c0_25, %c0_26, %c0_27], %76 {strides = array<i32>} : memref<1x1x8x128xf32, #tpu.memory_space<vmem>>, vector<1x1x8x128xf32>,
    return
  }
  func.func @transform_0(%arg0: i32, %arg1: i32) -> (i32, i32, i32) {
    %c0_i32 = arith.constant 0 : i32
    %c0_i32_0 = arith.constant 0 : i32
    return %arg0, %arg1, %c0_i32 : i32, i32, i32
  }
  func.func @transform_1(%arg0: i32, %arg1: i32) -> (i32, i32, i32, i32) {
    %c0_i32 = arith.constant 0 : i32
    %c0_i32_0 = arith.constant 0 : i32
    %c0_i32_1 = arith.constant 0 : i32
    return %arg0, %arg1, %c0_i32, %c0_i32_0 : i32, i32, i32, i32
  }
}

</mosaic_0001>

<bundles_post_ra>
// kernel: wem_loss.1
= control target key start
LH: loop header
LB: loop body
LE: loop exit
PB: predicated region body
PF: predicated region fallthrough
CT: control target
= control target key end

     0   :  { %s390_s6 = smov 0   ;;  %s392_s7 = smov 0   ;;  %s427_s0 = inlined_call_operand.vmem [shape: f32[2,16,128], index: 0, kind: input, shape index: {}]   ;;  %s428_s1 = inlined_call_operand.vmem [shape: f32[2,1,8,128], index: 1, kind: output, shape index: {}]  }
   0x1   :  { %s394_s8 = smov 0  }
   0x2 LB: > { %s23_s9 = sadd.s32 1, %s371_s7  ;;  %p318_p0 = scmp.ge.s32.totalorder %s375_s8, 1  ;;  %s375_s8 = sphi %s394_s8, %s11_s8   ;;  %s371_s7 = sphi %s392_s7, %s430_s7   ;;  %s367_s6 = sphi %s390_s6, %s429_s6  }
   0x3   : > { %p25_p1 = scmp.ge.s32.totalorder %s23_s9, 2  ;;  %p108_p2 = scmp.lt.s32.totalorder %s375_s8, 3 }
   0x5   : > { %s432_s9 = smov (%p25_p1, %s23_s9), 0  ;;  %p109_p3 = pnand %p318_p0, %p108_p2 }
   0x6   : > { %p135_p4 = scmp.lt.s32.totalorder (!%p109_p3), %s367_s6, 1  ;;  %s377_s10 = smov (!%p109_p3), 1  }
   0x7   : > { %112 = sbr.rel (%p109_p3) target bundleno = 408 (0x198), region = 24 }
   0xc   : > { %v151_v0 = vlaneseq  ;;  %s434_s6 = smov (!%p135_p4, %s367_s6), 1  ;;  %v378_v6 = vmov 0.0   ;;  %v379_v40 = vmov 0  }
   0xd   : > { %s325_s11 = sshll.u32 %s434_s6, 4  ;;  %s321_s15 = sshll.u32 %s434_s6, 3 }
   0xe   : > { %v152_v1 = vand.u32 127, %v151_v0  ;;  %s142_s14 = scalar_lea.vmem %s427_s0, %s325_s11  ;;  %v169_v23 = vshrl.u32 %v151_v0, 7  ;;  %s150_s18 = scalar_lea.vmem %s428_s1, %s321_s15 }
   0xf   : > { %v180_v2 = vld [vmem:[%s142_s14 + $0x8] sm:$0xff]  ;;  %v179_v3 = vld [vmem:[%s142_s14] sm:$0xff] }
  0x10   : > { %153 = vrot.lane.b32.xlu0 %v152_v1, %s377_s10  ;;  %205 = vrot.lane.b32.xlu1 %v180_v2, %s377_s10  ;;  %v322_v4 = vadd.s32 4294967295, %v152_v1  ;;  %v182_v14 = vmul.f32 %v180_v2, %v180_v2  ;;  %v181_v15 = vmul.f32 %v179_v3, %v179_v3  ;;  %vm211_vm1 = vcmp.lt.s32.totalorder %v169_v23, 1 }
  0x11   : > { %v170_v29 = vadd.s32 8, %v169_v23  ;;  %v171_v34 = vand.u32 1, %v152_v1  ;;  %v173_v35 = vand.u32 1, %v169_v23  ;;  %v193_v39 = vadd.f32 %v180_v2, %v179_v3 }
  0x12   : > { %v183_v16 = vadd.f32 %v182_v14, %v181_v15  ;;  %vm232_vm8 = vcmp.eq.s32.totalorder %v169_v23, 2  ;;  %vm231_vm9 = vcmp.eq.s32.totalorder %v169_v23, 1  ;;  %vm230_vm10 = vcmp.eq.s32.totalorder %v169_v23, 0 }
  0x13   : > { %v174_v36 = vand.u32 1, %v170_v29  ;;  %v194_v45 = vrot.slane %v193_v39, 4 }
  0x14   : > { %v184_v19 = vrot.slane %v183_v16, 4 }
  0x15   : > { %v195_v49 = vadd.f32 %v194_v45, %v193_v39 }
  0x16   : > { %v185_v20 = vadd.f32 %v184_v19, %v183_v16 }
  0x17   : > { %v196_v52 = vrot.slane %v195_v49, 2 }
  0x18   : > { %203 = vrot.lane.b32.xlu0 %v179_v3, %s377_s10  ;;  %v186_v24 = vrot.slane %v185_v20, 2 }
  0x19   : > { %v197_v55 = vadd.f32 %v196_v52, %v195_v49 }
  0x1a   : > { %v187_v25 = vadd.f32 %v186_v24, %v185_v20 }
  0x1b   : > { %v198_v57 = vrot.slane %v197_v55, 1 }
  0x1c   : > { %v188_v28 = vrot.slane %v187_v25, 1 }
  0x1d   : > { %v199_v58 = vadd.f32 %v198_v57, %v197_v55 }
  0x1e   : > { %v189_v31 = vadd.f32 %v188_v28, %v187_v25 }
  0x42   : > { %190 = vadd.xlane.f32.xlu0 %v189_v31 }
  0x82   : > { %v154_v5 = vpop.permute.xlu0 %153  ;;  %v206_v17 = vpop.permute.xlu1 %205 }
  0x83   : > { %vm156_vm0 = vcmp.eq.s32.totalorder %v154_v5, %v322_v4  ;;  %v208_v21 = vadd.f32 %v206_v17, %v180_v2 }
  0x84   : > { %v157_v7 = vsel %vm156_vm0, 1.0, %v378_v6 }
  0x85   : > { %v158_v8 = vrot.slane %v157_v7, 4  ;;  %v210_v26 = vrot.slane %v208_v21, 7 }
  0x87   : > { %v159_v9 = vadd.f32 %v158_v8, %v157_v7 }
  0x89   : > { %v160_v10 = vrot.slane %v159_v9, 2 }
  0x8a   : > { %v204_v18 = vpop.permute.xlu0 %203 }
  0x8b   : > { %v161_v11 = vadd.f32 %v160_v10, %v159_v9  ;;  %v207_v22 = vadd.f32 %v204_v18, %v179_v3 }
  0x8d   : > { %v162_v12 = vrot.slane %v161_v11, 1  ;;  %v209_v27 = vrot.slane %v207_v22, 7 }
  0x8f   : > { %v163_v13 = vadd.f32 %v162_v12, %v161_v11  ;;  %v213_v30 = vsel %vm211_vm1, %v210_v26, %v209_v27  ;;  %v212_v32 = vsel %vm211_vm1, %v209_v27, %v210_v26 }
  0x90   : > { %v214_v33 = vadd.f32 %v213_v30, %v207_v22  ;;  %v215_v38 = vadd.f32 %v212_v32, %v208_v21 }
  0x91   : > { %164 = vadd.xlane.f32.xlu1 %v163_v13 }
  0x92   : > { %v216_v42 = vmul.f32 %v214_v33, %v214_v33  ;;  %v217_v43 = vmul.f32 %v215_v38, %v215_v38 }
  0xb5   : > { %v191_v60 = vpop.xlane.xlu0 %190 }
 0x104   : > { %v165_v37 = vpop.xlane.xlu1 %164 }
 0x105   : > { %vm166_vm2 = vcmp.gt.f32.partialorder %v165_v37, 0.0 }
 0x106   : > { %v167_v41 = vsel %vm166_vm2, 1, %v379_v40 }
 0x107   : > { %vm172_vm3 = vcmp.eq.s32.totalorder %v171_v34, %v167_v41  ;;  %vm175_vm4 = vcmp.eq.s32.totalorder %v173_v35, %v167_v41  ;;  %vm176_vm5 = vcmp.eq.s32.totalorder %v174_v36, %v167_v41 }
 0x108   : > { %vm177_vm6 = vmand %vm172_vm3, %vm175_vm4 }
 0x109   : > { %vm178_vm7 = vmand %vm172_vm3, %vm176_vm5  ;;  %v218_v44 = vsel %vm177_vm6, %v216_v42, 0.0 }
 0x10a   : > { %v219_v46 = vsel %vm178_vm7, %v217_v43, 0.0 }
 0x10b   : > { %v220_v47 = vadd.f32 %v219_v46, %v218_v44 }
 0x10d   : > { %v221_v48 = vrot.slane %v220_v47, 4 }
 0x10f   : > { %v222_v50 = vadd.f32 %v221_v48, %v220_v47 }
 0x111   : > { %v223_v51 = vrot.slane %v222_v50, 2 }
 0x113   : > { %v224_v53 = vadd.f32 %v223_v51, %v222_v50 }
 0x115   : > { %v225_v54 = vrot.slane %v224_v53, 1 }
 0x117   : > { %v226_v56 = vadd.f32 %v225_v54, %v224_v53 }
 0x119   : > { %227 = vadd.xlane.f32.xlu2 %v226_v56 }
 0x121   : > { %200 = vadd.xlane.f32.xlu2 %v199_v58 }
 0x18c   : > { %v228_v59 = vpop.xlane.xlu2 %227 }
 0x18d   : > { %v233_v61 = vsel %vm232_vm8, %v228_v59, 0.0 }
 0x194   : > { %v201_v62 = vpop.xlane.xlu2 %200 }
 0x195   : > { %v234_v63 = vsel %vm231_vm9, %v201_v62, %v233_v61 }
 0x196   : > { %v235_v0 = vsel %vm230_vm10, %v191_v60, %v234_v63 }
 0x197   : > { %236 = vst [vmem:[%s150_s18] sm:$0xff] %v235_v0 }
 0x198 PF: > { %s11_s8 = sadd.s32 1, %s375_s8   ;;  %s429_s6 = smov %s371_s7 }
 0x199   : > { %p8_p5 = scmp.ge.s32.totalorder %s11_s8, 4   ;;  %s430_s7 = smov %s432_s9 }
 0x19b   :  { %10 = sbr.rel (!%p8_p5) target bundleno = 2 (0x2), region = 54 }

</bundles_post_ra>
